<compile_context>
chip_gen: v7x
topology: tpu7x:2x2x1
jax: 0.10.0
libtpu: 0.0.40
codegen_flags: <defaults>
</compile_context>

<pallas_src>
import math

import jax
import jax.numpy as jnp
from jax.experimental import pallas as pl
from jax.experimental.pallas import tpu as pltpu


def feature_regression_kernel(x_ref, w_ref, b_ref, o_ref):
    # x_ref: (TBp, Dp), w_ref: (Dp, Dp), b_ref: (1, Dp), o_ref: (TBp, Dp)
    acc = jnp.dot(x_ref[...], w_ref[...], preferred_element_type=jnp.float32)
    acc = acc + b_ref[...].astype(jnp.float32)  # (1, Dp) broadcast over rows
    o_ref[...] = acc.astype(o_ref.dtype)


def feature_regression(x, W, b, *, tb_packed=4096):
    """z = x @ (W with zeroed diagonal).T + b, lane-packed Pallas kernel."""
    B, D = x.shape
    assert W.shape == (D, D)
    assert b.shape == (D,)

    # ---- one-time weight/bias prep (O(D^2), reused across the whole batch) ----
    W_masked = W * (1.0 - jnp.eye(D, dtype=W.dtype))  # zero the diagonal once

    # Lane-pack P feature rows per 128-lane vreg row when D divides 128.
    P = 128 // D if (D < 128 and 128 % D == 0) else 1
    Dp = P * D
    # Block-diagonal packed weight: packed_x @ kron(I_P, W_masked.T) applies
    # W_masked.T independently to each of the P packed batch rows.
    Wp = jnp.kron(jnp.eye(P, dtype=W.dtype), W_masked.T)  # (Dp, Dp)
    bp = jnp.tile(b, P).reshape(1, Dp)

    # ---- batch tiling in packed rows ----
    Bp = pl.cdiv(B, P)  # packed rows needed to hold B unpacked rows
    if Bp > tb_packed:
        TBp = tb_packed                      # large batch: big multiple-of-8 tile
    elif Bp >= 16:
        TBp = ((pl.cdiv(Bp, 2) + 7) // 8) * 8  # >=2 tiles -> v7x megacore split
    else:
        TBp = Bp                             # tiny batch: one full-array tile
    Bp_pad = pl.cdiv(Bp, TBp) * TBp
    B_pad = Bp_pad * P

    if B_pad != B:
        x = jnp.pad(x, ((0, B_pad - B), (0, 0)))
    xp = x.reshape(Bp_pad, Dp)               # free, contiguity-preserving reshape

    grid = (Bp_pad // TBp,)

    out_p = pl.pallas_call(
        feature_regression_kernel,
        out_shape=jax.ShapeDtypeStruct((Bp_pad, Dp), x.dtype),
        grid_spec=pl.GridSpec(
            grid=grid,
            in_specs=[
                pl.BlockSpec((TBp, Dp), lambda i: (i, 0)),  # x: tiled over batch
                pl.BlockSpec((Dp, Dp), lambda i: (0, 0)),   # Wp: VMEM-resident
                pl.BlockSpec((1, Dp), lambda i: (0, 0)),    # bp: VMEM-resident
            ],
            out_specs=pl.BlockSpec((TBp, Dp), lambda i: (i, 0)),
        ),
        compiler_params=pltpu.CompilerParams(
            # Batch tiles are independent -> shard across TensorCores.
            dimension_semantics=("parallel",)
        ),
    )(xp, Wp, bp)

    out = out_p.reshape(B_pad, D)
    return out[:B] if B_pad != B else out


def feature_regression_ref(x, W, b):
    D = W.shape[0]
    m = jnp.ones((D, D), x.dtype) - jnp.eye(D, dtype=x.dtype)
    return x @ (W * m).T + b


if __name__ == "__main__":
    key = jax.random.PRNGKey(0)
    D = 32  # input_size=32

    kx, kw, kb, kx2, kx3 = jax.random.split(key, 5)
    # Deterministic init matching reset_parameters(): uniform(-stdv, stdv)
    stdv = 1.0 / math.sqrt(D)
    W = jax.random.uniform(kw, (D, D), jnp.float32, minval=-stdv, maxval=stdv)
    b = jax.random.uniform(kb, (D,), jnp.float32, minval=-stdv, maxval=stdv)

    # Small shape matching the module (batch=8): single full-array packed tile.
    x_small = jax.random.normal(kx, (8, D), jnp.float32)
    out_small = jax.block_until_ready(feature_regression(x_small, W, b))
    ref_small = feature_regression_ref(x_small, W, b)
    assert out_small.shape == (8, D)
    assert jnp.allclose(out_small, ref_small, atol=1e-5, rtol=1e-5), "mismatch (small)"

    # Larger batch: packed rows = 512 -> two parallel tiles of 256 (grid=(2,)).
    x_big = jax.random.normal(kx2, (2048, D), jnp.float32)
    out_big = jax.block_until_ready(feature_regression(x_big, W, b))
    ref_big = feature_regression_ref(x_big, W, b)
    assert out_big.shape == (2048, D)
    assert jnp.allclose(out_big, ref_big, atol=1e-5, rtol=1e-5), "mismatch (big)"

    # Batch not a multiple of the pack/tile sizes: exercises the zero-pad path.
    x_odd = jax.random.normal(kx3, (1000, D), jnp.float32)
    out_odd = jax.block_until_ready(feature_regression(x_odd, W, b))
    ref_odd = feature_regression_ref(x_odd, W, b)
    assert out_odd.shape == (1000, D)
    assert jnp.allclose(out_odd, ref_odd, atol=1e-5, rtol=1e-5), "mismatch (odd)"

    print("KERNEL_OK")
</pallas_src>

<mosaic_0001>
module attributes {stable_mosaic.version = 11 : i64} {
  func.func @feature_regression_kernel(%arg0: i32, %arg1: memref<2x128xf32, #tpu.memory_space<vmem>>, %arg2: memref<128x128xf32, #tpu.memory_space<vmem>>, %arg3: memref<1x128xf32, #tpu.memory_space<vmem>>, %arg4: memref<2x128xf32, #tpu.memory_space<vmem>>) attributes {dimension_semantics = [#tpu.dimension_semantics<parallel>], iteration_bounds = array<i64: 1>, scalar_prefetch = 0 : i64, scratch_operands = 0 : i64, tpu.core_type = #tpu.core_type<tc>, window_params = [{transform_indices = @transform_0, window_bounds = array<i64: 2, 128>}, {pipeline_mode = #tpu.pipeline_mode<synchronous>, transform_indices = @transform_1, window_bounds = array<i64: 128, 128>}, {pipeline_mode = #tpu.pipeline_mode<synchronous>, transform_indices = @transform_2, window_bounds = array<i64: 1, 128>}, {transform_indices = @transform_3, window_bounds = array<i64: 2, 128>}]} {
    %c0 = arith.constant 0 : index
    %c0_0 = arith.constant 0 : index
    %0 = vector.load %arg1[%c0, %c0_0] : memref<2x128xf32, #tpu.memory_space<vmem>>, vector<2x128xf32>
    %c0_1 = arith.constant 0 : index
    %c0_2 = arith.constant 0 : index
    %1 = vector.load %arg2[%c0_1, %c0_2] : memref<128x128xf32, #tpu.memory_space<vmem>>, vector<128x128xf32>
    %cst = arith.constant dense<0.000000e+00> : vector<2x128xf32>
    %2 = tpu.matmul %0, %1, %cst {dimension_numbers = #tpu.dot_dimension_numbers<[1], [0], [0], [1], [0, 0, 1, 1], [], []>} : vector<2x128xf32>, vector<128x128xf32>, vector<2x128xf32> -> vector<2x128xf32>
    %c0_3 = arith.constant 0 : index
    %c0_4 = arith.constant 0 : index
    %3 = vector.load %arg3[%c0_3, %c0_4] : memref<1x128xf32, #tpu.memory_space<vmem>>, vector<1x128xf32>
    %4 = vector.broadcast %3 : vector<1x128xf32> to vector<2x128xf32>
    %5 = arith.addf %2, %4 : vector<2x128xf32>
    %c0_5 = arith.constant 0 : index
    %c0_6 = arith.constant 0 : index
    %6 = vector.load %arg4[%c0_5, %c0_6] : memref<2x128xf32, #tpu.memory_space<vmem>>, vector<2x128xf32>
    tpu.vector_store %arg4[%c0_5, %c0_6], %5 {strides = array<i32>} : memref<2x128xf32, #tpu.memory_space<vmem>>, vector<2x128xf32>,
    return
  }
  func.func @transform_0(%arg0: i32) -> (i32, i32) {
    %c0_i32 = arith.constant 0 : i32
    %c0_i32_0 = arith.constant 0 : i32
    return %arg0, %c0_i32 : i32, i32
  }
  func.func @transform_1(%arg0: i32) -> (i32, i32) {
    %c0_i32 = arith.constant 0 : i32
    %c0_i32_0 = arith.constant 0 : i32
    %c0_i32_1 = arith.constant 0 : i32
    return %c0_i32, %c0_i32_0 : i32, i32
  }
  func.func @transform_2(%arg0: i32) -> (i32, i32) {
    %c0_i32 = arith.constant 0 : i32
    %c0_i32_0 = arith.constant 0 : i32
    %c0_i32_1 = arith.constant 0 : i32
    return %c0_i32, %c0_i32_0 : i32, i32
  }
  func.func @transform_3(%arg0: i32) -> (i32, i32) {
    %c0_i32 = arith.constant 0 : i32
    %c0_i32_0 = arith.constant 0 : i32
    return %arg0, %c0_i32 : i32, i32
  }
}

</mosaic_0001>

<bundles_post_ra>
// kernel: tpu_custom_call.1
= control target key start
LH: loop header
LB: loop body
LE: loop exit
PB: predicated region body
PF: predicated region fallthrough
CT: control target
= control target key end

     0   :  { %8 = vsyncpa [#allocation3], 0  ;;  %s383_s0 = inlined_call_operand.hbm [shape: f32[2,128], index: 0, kind: input, shape index: {}]   ;;  %s384_s1 = inlined_call_operand.hbm [shape: f32[128,128], index: 1, kind: input, shape index: {}]   ;;  %s385_s2 = inlined_call_operand.vmem [shape: f32[1,128], index: 2, kind: input, shape index: {}]   ;;  %s386_s3 = inlined_call_operand.hbm [shape: f32[2,128], index: 3, kind: output, shape index: {}]  }
   0x1   :  { %9 = vsyncpa [#allocation6], 0 }
   0x2   :  { %10 = vsyncpa [#allocation4], 0  ;;  %s309_s12 = smov [#allocation2]   ;;  %s310_s14 = smov [#allocation5]  }
   0x3   :  { %s17_s13 = sshll.u32 %s309_s12, 4  ;;  %s26_s15 = sshll.u32 %s310_s14, 4  ;;  %s18_s13 = int_to_ptr.vmem [resolvable:$true] %s17_s13  ;;  %s337_s15 = int_to_ptr.vmem [resolvable:$true] %s26_s15 }
   0x4   :  { %s237_s18 = scalar_lea.hbm %s383_s0, 32 }
   0x5   :  { %p238_p0 = scmp.ne.s32.totalorder %s383_s0, %s237_s18  ;;  %p241_p1 = scmp.lt.u32.totalorder %s237_s18, %s383_s0 }
   0x7   :  { %p243_p2 = pnand %p241_p1, %p238_p0 }
   0x9   :  { %246 = shalt.err (!%p243_p2)
}
   0xa   :  { %s247_s23 = scalar_lea.vmem %s18_s13, 32  ;;  %p252_p4 = scmp.lt.s32.totalorder %s18_s13, %s18_s13 }
   0xb   :  { %p248_p3 = scmp.ne.s32.totalorder %s18_s13, %s247_s23  ;;  %p253_p5 = scmp.lt.s32.totalorder %s247_s23, %s247_s23 }
   0xd   :  { %p254_p6 = por %p253_p5, %p252_p4 }
   0xf   :  { %p255_p7 = pnand %p254_p6, %p248_p3 }
  0x11   :  { %258 = shalt.err (!%p255_p7)
}
  0x12   :  { %20 = dma.hbm_to_vmem [thread:$0]  %s383_s0, 32, %s18_s13, [#allocation3]  }
  0x13   :  { %s259_s28 = scalar_lea.hbm %s384_s1, 2048 }
  0x14   :  { %p260_p8 = scmp.ne.s32.totalorder %s384_s1, %s259_s28  ;;  %p263_p9 = scmp.lt.u32.totalorder %s259_s28, %s384_s1 }
  0x16   :  { %p265_p10 = pnand %p263_p9, %p260_p8 }
  0x18   :  { %268 = shalt.err (!%p265_p10)
}
  0x19   :  { %s269_s6 = scalar_lea.vmem %s337_s15, 2048  ;;  %p274_p12 = scmp.lt.s32.totalorder %s337_s15, %s337_s15 }
  0x1a   :  { %p270_p11 = scmp.ne.s32.totalorder %s337_s15, %s269_s6  ;;  %p275_p13 = scmp.lt.s32.totalorder %s269_s6, %s269_s6 }
  0x1c   :  { %p276_p0 = por %p275_p13, %p274_p12 }
  0x1e   :  { %p277_p1 = pnand %p276_p0, %p270_p11 }
  0x20   :  { %280 = shalt.err (!%p277_p1)
}
  0x21   :  { %s311_s0 = smov 128   ;;  %s312_s7 = smov 8  }
  0x22   :  { %32 = dma.hbm_to_vmem [thread:$0]  %s384_s1, 2048, %s337_s15, [#allocation6], %s311_s0, %s311_s0, %s312_s7  }
  0x23   :  { %303 = dma.done.wait [#allocation3], 32  }
  0x24   :  { %304 = vsyncadd [#allocation3], 4294967264 }
  0x25   :  { %305 = dma.done.wait [#allocation6], 2048  }
  0x26   :  { %306 = vsyncadd [#allocation6], 4294965248  ;;  %v313_v0 = vmov 0.0|0.0   ;;  %vm314_vm0 = vmmov 0   ;;  %v315_v1 = vmov 0.0   ;;  %v42_v2 = vld [vmem:[#allocation5] sm:$0xff] }
  0x27   :  { %205 = vmatprep.subr.bf16.mxu0 %v313_v0  ;;  %202 = vmatprep.mubr.msk.f32.mxu0 %vm314_vm0, %v315_v1  ;;  %v43_v3 = vld [vmem:[#allocation5 + $0x8] sm:$0xff]  ;;  %v44_v4 = vld [vmem:[#allocation5 + $0x10] sm:$0xff]  ;;  %v45_v6 = vld [vmem:[#allocation5 + $0x18] sm:$0xff]  ;;  %s316_s11 = smov [#allocation7]  }
  0x28   :  { %v206_v5 = vpack.c.bf16 %v43_v3, %v42_v2  ;;  %v209_v7 = vpack.c.bf16 %v45_v6, %v44_v4  ;;  %v46_v8 = vld [vmem:[#allocation5 + $0x20] sm:$0xff]  ;;  %v47_v9 = vld [vmem:[#allocation5 + $0x28] sm:$0xff]  ;;  %v48_v11 = vld [vmem:[#allocation5 + $0x30] sm:$0xff]  ;;  %s142_s12 = sshll.u32 %s316_s11, 4  ;;  %s143_s12 = int_to_ptr.vmem [resolvable:$true] %s142_s12 }
  0x29   :  { %v212_v10 = vpack.c.bf16 %v47_v9, %v46_v8  ;;  %v49_v12 = vld [vmem:[#allocation5 + $0x38] sm:$0xff]  ;;  %v50_v14 = vld [vmem:[#allocation5 + $0x40] sm:$0xff]  ;;  %v51_v15 = vld [vmem:[#allocation5 + $0x48] sm:$0xff]  ;;  %s281_s13 = scalar_lea.vmem %s143_s12, 32  ;;  %p286_p3 = scmp.lt.s32.totalorder %s143_s12, %s143_s12 }
  0x2a   :  { %207 = vmatpush3.bf16.msra.mxu0 %v206_v5  ;;  %v215_v13 = vpack.c.bf16 %v49_v12, %v48_v11  ;;  %v218_v16 = vpack.c.bf16 %v51_v15, %v50_v14  ;;  %v52_v17 = vld [vmem:[#allocation5 + $0x50] sm:$0xff]  ;;  %v53_v18 = vld [vmem:[#allocation5 + $0x58] sm:$0xff]  ;;  %v54_v20 = vld [vmem:[#allocation5 + $0x60] sm:$0xff]  ;;  %p282_p2 = scmp.ne.s32.totalorder %s143_s12, %s281_s13  ;;  %p287_p4 = scmp.lt.s32.totalorder %s281_s13, %s281_s13 }
  0x2b   :  { %208 = vmatprep.subr.bf16.mxu0 %v313_v0  ;;  %v221_v19 = vpack.c.bf16 %v53_v18, %v52_v17  ;;  %v55_v21 = vld [vmem:[#allocation5 + $0x68] sm:$0xff]  ;;  %v56_v23 = vld [vmem:[#allocation5 + $0x70] sm:$0xff]  ;;  %v57_v24 = vld [vmem:[#allocation5 + $0x78] sm:$0xff] }
  0x2c   :  { %v224_v22 = vpack.c.bf16 %v55_v21, %v54_v20  ;;  %v227_v25 = vpack.c.bf16 %v57_v24, %v56_v23  ;;  %v41_v26 = vld [vmem:[#allocation2] sm:$0x3]  ;;  %p288_p5 = por %p287_p4, %p286_p3 }
  0x2d   :  { %v152_v27 = vld [vmem:[%s385_s2] ss:$0 sm:$0xff] }
  0x2e   :  { %210 = vmatpush3.bf16.msra.mxu0 %v209_v7  ;;  %p289_p6 = pnand %p288_p5, %p282_p2 }
  0x2f   :  { %211 = vmatprep.subr.bf16.mxu0 %v313_v0 }
  0x32   :  { %213 = vmatpush3.bf16.msra.mxu0 %v212_v10 }
  0x33   :  { %214 = vmatprep.subr.bf16.mxu0 %v313_v0 }
  0x36   :  { %216 = vmatpush3.bf16.msra.mxu0 %v215_v13 }
  0x37   :  { %217 = vmatprep.subr.bf16.mxu0 %v313_v0 }
  0x3a   :  { %219 = vmatpush3.bf16.msra.mxu0 %v218_v16 }
  0x3b   :  { %220 = vmatprep.subr.bf16.mxu0 %v313_v0 }
  0x3e   :  { %222 = vmatpush3.bf16.msra.mxu0 %v221_v19 }
  0x3f   :  { %223 = vmatprep.subr.bf16.mxu0 %v313_v0 }
  0x42   :  { %225 = vmatpush3.bf16.msra.mxu0 %v224_v22 }
  0x43   :  { %226 = vmatprep.subr.bf16.mxu0 %v313_v0 }
  0x46   :  { %228 = vmatpush3.bf16.msra.mxu0 %v227_v25 }
  0x49   :  { %203 = vmatmul.mubr.f32.vlgmr.msra.gmra.mrb[0].mxu0 %v41_v26 }
 0x11c   :  { %v131_v28 = vpop.f32.mrb[0].mxu0 }
 0x11d   :  { %v132_v29 = vadd.f32 %v152_v27, %v131_v28  ;;  %v204_v30 = vpop.f32.mrb[1].mxu0 }
 0x11f   :  { %135 = vst [vmem:[#allocation7] sm:$0x3] %v132_v29 }
 0x120   :  { %292 = shalt.err (!%p289_p6)
}
 0x121   :  { %s293_s16 = scalar_lea.hbm %s386_s3, 32 }
 0x122   :  { %p294_p7 = scmp.ne.s32.totalorder %s386_s3, %s293_s16  ;;  %p297_p8 = scmp.lt.u32.totalorder %s293_s16, %s386_s3 }
 0x124   :  { %p299_p9 = pnand %p297_p8, %p294_p7 }
 0x126   :  { %302 = shalt.err (!%p299_p9)
}
 0x127   :  { %145 = dma.vmem_to_hbm [thread:$0]  %s143_s12, 32, %s386_s3, [#allocation4]  }
 0x128   :  { %307 = dma.done.wait [#allocation4], 32  }
 0x129   :  { %308 = vsyncadd [#allocation4], 4294967264 }
 0x12a   :  { %149 = vsyncpa [#allocation3], 1 }
 0x12b   :  { %150 = vsyncpa [#allocation6], 1 }
 0x12c   :  { %151 = vsyncpa [#allocation4], 1 }

</bundles_post_ra>
